<compile_context>
chip_gen: v6e
topology: v6e:2x2x1
jax: 0.10.0
libtpu: 0.0.40
codegen_flags: <defaults>
</compile_context>

<pallas_src>
import time
from functools import partial
from typing import Tuple

import jax
import jax.numpy as jnp
from jax.experimental import pallas as pl
from jax.experimental.pallas import tpu as pltpu


def _round_up(x: int, m: int) -> int:
    return ((x + m - 1) // m) * m


def _lane_round(n: int) -> int:
    # v5e MXU is 4x128x128 (128-wide tiles fill it); v6e/v7x MXU is 2x256x256,
    # so above 128 pad matmul N/K dims to multiples of 256.
    return _round_up(n, 128) if n <= 128 else _round_up(n, 256)


# ----------------------------------------------------------------------------
# Monitoring glue (plain Python; host-side timing, no Pallas equivalent).
# NOTE: without block_for_timing=True these timings measure host dispatch,
# not device execution (JAX is async) — use xprof for real device timing.
# ----------------------------------------------------------------------------
class ThroughputMonitor:
    def __init__(self):
        self.records = []
        self._fwd_start = None
        self._bwd_start = None
        self._batch = 0
        self._seq = 0

    def start_forward(self, batch_size: int, seq_length: int) -> None:
        self._batch, self._seq = batch_size, seq_length
        self._fwd_start = time.perf_counter()

    def end_forward(self) -> None:
        dt = time.perf_counter() - self._fwd_start
        self.records.append(
            dict(kind="forward", batch=self._batch, seq=self._seq, seconds=dt)
        )

    def start_backward(self) -> None:
        self._bwd_start = time.perf_counter()

    def end_backward(self) -> None:
        dt = time.perf_counter() - self._bwd_start
        self.records.append(dict(kind="backward", seconds=dt))


def extract_batch_info(x) -> Tuple[int, int]:
    """Mirror of InstrumentedModel.extract_batch_info."""
    if isinstance(x, jnp.ndarray):
        if x.ndim >= 2:
            return (int(x.shape[0]), int(x.shape[1]))
        elif x.ndim == 1:
            return (1, int(x.shape[0]))
    elif isinstance(x, (list, tuple)) and len(x) > 0:
        return extract_batch_info(x[0])
    return (1, 1)


# ----------------------------------------------------------------------------
# Pallas kernel: fused Linear -> GELU(erf form) -> Linear.
# ----------------------------------------------------------------------------
_INV_SQRT2 = 0.7071067811865476


def _erf_f32(x):
    """erf via Abramowitz & Stegun 7.1.26 (max abs err ~1.5e-7 + approx-recip).

    Built only from ops with guaranteed Mosaic lowerings (abs, select, mul/add,
    EUP exp + approx reciprocal).  The approx reciprocal keeps the divide on
    the EUP slot (the exp is the only other EUP op) instead of the VALU.
    """
    p = jnp.float32(0.3275911)
    a1 = jnp.float32(0.254829592)
    a2 = jnp.float32(-0.284496736)
    a3 = jnp.float32(1.421413741)
    a4 = jnp.float32(-1.453152027)
    a5 = jnp.float32(1.061405429)
    sgn = jnp.where(x < 0.0, jnp.float32(-1.0), jnp.float32(1.0))
    ax = jnp.abs(x)
    t = pl.reciprocal(1.0 + p * ax, approx=True)
    poly = ((((a5 * t + a4) * t + a3) * t + a2) * t + a1) * t
    return sgn * (1.0 - poly * jnp.exp(-ax * ax))


def _gelu_erf_f32(x):
    return 0.5 * x * (1.0 + _erf_f32(x * jnp.float32(_INV_SQRT2)))


def _mlp_kernel(x_ref, w1_ref, b1_ref, w2_ref, b2_ref, o_ref):
    # x_ref: (TM, Hp) f32 row tile; cast to bf16 in-register for the MXU
    # (avoids a separate padded-bf16 copy of x in HBM).
    # w1/w2: bf16, VMEM-resident across the grid.  b1/b2: (1, Fp)/(1, Hp) f32,
    # VMEM-resident; broadcast against the tile without materialization.
    x = x_ref[...].astype(jnp.bfloat16)
    h = jnp.dot(x, w1_ref[...], preferred_element_type=jnp.float32)
    h = h + b1_ref[...]                          # f32 VPU math (v5e-safe)
    h = _gelu_erf_f32(h)                         # erf-form GELU, f32
    o = jnp.dot(h.astype(jnp.bfloat16), w2_ref[...],
                preferred_element_type=jnp.float32)
    o = o + b2_ref[...]
    o_ref[...] = o.astype(o_ref.dtype)           # f32, lane-dense output


@partial(jax.jit, static_argnames=("max_tile_rows",))
def mlp_forward_pallas(x2d, w1p, b1p, w2p, b2p, max_tile_rows=2048):
    """x2d: (rows, H) f32.  w1p/b1p/w2p/b2p: pre-padded (bf16/f32) parameters.

    Returns (rows, H) float32.
    """
    rows, H = x2d.shape
    Hp, Fp = w1p.shape

    # Big row tiles (per-grid-step overhead ~0.35us; 512-2048 rows reaches
    # ~85% of HBM roofline) but guarantee >=2 grid steps so the "parallel"
    # rows axis can be sharded across v7x's 2 TensorCores.
    tm = min(max_tile_rows, _round_up(max(1, -(-rows // 2)), 8))
    rows_p = _round_up(rows, tm)
    n_tiles = rows_p // tm

    # Only materialize a padded copy of x when padding is actually required;
    # bf16 cast happens inside the kernel either way.
    needs_pad = (rows_p != rows) or (Hp != H)
    if needs_pad:
        xk = jnp.zeros((rows_p, Hp), x2d.dtype).at[:rows, :H].set(x2d)
    else:
        xk = x2d

    # VMEM budget from actual resident sizes (+ headroom).  Above a threshold,
    # single-buffer the constant-index weight blocks so the fused kernel stays
    # inside v7x's 64 MiB physical VMEM at real model sizes.
    weight_bytes = ((w1p.size + w2p.size) * 2          # bf16 weights
                    + (b1p.size + b2p.size) * 4)       # f32 biases
    single_buf_weights = 2 * weight_bytes > (40 << 20)

    def _resident(shape):
        if single_buf_weights:
            return pl.BlockSpec(shape, lambda i: (0, 0),
                                pipeline_mode=pl.Buffered(1))
        return pl.BlockSpec(shape, lambda i: (0, 0))

    io_bytes = 2 * (tm * Hp * 4) + 2 * (tm * Hp * 4)   # x-in + out, double-buffered f32
    vmem_limit = (weight_bytes * (1 if single_buf_weights else 2)
                  + io_bytes + (8 << 20))
    vmem_limit = int(min(max(vmem_limit, 32 << 20), 96 << 20))

    flops = 2 * rows_p * Hp * Fp * 2                   # two matmuls
    bytes_accessed = xk.size * 4 + weight_bytes + rows_p * Hp * 4

    out_p = pl.pallas_call(
        _mlp_kernel,
        out_shape=jax.ShapeDtypeStruct((rows_p, Hp), jnp.float32),
        grid=(n_tiles,),
        in_specs=[
            pl.BlockSpec((tm, Hp), lambda i: (i, 0)),  # x: row-tiled, pipelined
            _resident((Hp, Fp)),                       # w1: VMEM-resident
            _resident((1, Fp)),                        # b1: VMEM-resident
            _resident((Fp, Hp)),                       # w2: VMEM-resident
            _resident((1, Hp)),                        # b2: VMEM-resident
        ],
        out_specs=pl.BlockSpec((tm, Hp), lambda i: (i, 0)),
        compiler_params=pltpu.CompilerParams(
            dimension_semantics=("parallel",),         # rows axis -> 2 TCs on v7x
            vmem_limit_bytes=vmem_limit,
        ),
        cost_estimate=pl.CostEstimate(
            flops=flops,
            transcendentals=2 * rows_p * Fp,           # exp + approx-recip in erf
            bytes_accessed=bytes_accessed,
        ),
    )(xk, w1p, b1p, w2p, b2p)

    if needs_pad:
        return out_p[:rows, :H]
    return out_p


# ----------------------------------------------------------------------------
# InstrumentedModel equivalent.
# ----------------------------------------------------------------------------
class InstrumentedModelJAX:
    """Wraps the Pallas MLP forward with the same instrumentation semantics."""

    def __init__(self, params, monitor: ThroughputMonitor,
                 block_for_timing: bool = False):
        w1, b1, w2, b2 = params
        H, F = int(w1.shape[0]), int(w1.shape[1])
        Hp, Fp = _lane_round(H), _lane_round(F)

        # Pre-pad + pre-cast parameters ONCE (hoisted out of the per-call
        # jitted path): the kernel reads these buffers directly every call.
        self.w1p = jnp.zeros((Hp, Fp), jnp.bfloat16).at[:H, :F].set(
            w1.astype(jnp.bfloat16))
        self.b1p = jnp.zeros((1, Fp), jnp.float32).at[:, :F].set(
            jnp.reshape(b1, (1, F)).astype(jnp.float32))
        self.w2p = jnp.zeros((Fp, Hp), jnp.bfloat16).at[:F, :H].set(
            w2.astype(jnp.bfloat16))
        self.b2p = jnp.zeros((1, Hp), jnp.float32).at[:, :H].set(
            jnp.reshape(b2, (1, H)).astype(jnp.float32))
        jax.block_until_ready((self.w1p, self.b1p, self.w2p, self.b2p))

        self.H, self.F = H, F
        self.monitor = monitor
        self.block_for_timing = block_for_timing
        self._batch_size = 0
        self._seq_length = 0
        # TODO(synk): PyTorch backward-hook timing (register_hook on outputs /
        # autograd function hooks) has no Pallas/JAX forward-pass equivalent;
        # backward timing is omitted.

    def __call__(self, x):
        self._batch_size, self._seq_length = extract_batch_info(x)
        self.monitor.start_forward(self._batch_size, self._seq_length)

        B, S, H = x.shape
        out2d = mlp_forward_pallas(x.reshape(B * S, H),
                                   self.w1p, self.b1p, self.w2p, self.b2p)
        out = out2d.reshape(B, S, H)

        if self.block_for_timing:
            # Debug-only: forces device sync so end_forward measures device
            # time; prefer xprof traces for real timing.
            out = jax.block_until_ready(out)

        self.monitor.end_forward()
        return out


# ----------------------------------------------------------------------------
# Main
# ----------------------------------------------------------------------------
if __name__ == "__main__":
    B, S, H, F = 2, 8, 32, 64

    key = jax.random.PRNGKey(0)
    kx, k1, k2 = jax.random.split(key, 3)

    x = jax.random.normal(kx, (B, S, H), dtype=jnp.float32)
    w1 = jax.random.normal(k1, (H, F), dtype=jnp.float32) * (1.0 / jnp.sqrt(H))
    b1 = jnp.zeros((1, F), dtype=jnp.float32)
    w2 = jax.random.normal(k2, (F, H), dtype=jnp.float32) * (1.0 / jnp.sqrt(F))
    b2 = jnp.zeros((1, H), dtype=jnp.float32)

    monitor = ThroughputMonitor()
    model = InstrumentedModelJAX((w1, b1, w2, b2), monitor)

    out = model(x)
    out = jax.block_until_ready(out)

    # Reference with the same bf16 MXU operands / f32 accumulation and exact
    # (erf-form) GELU, computed in plain JAX.  Tolerance covers bf16 operand
    # rounding plus the A&S-erf + approx-reciprocal approximation (~1e-3).
    xb = x.reshape(B * S, H).astype(jnp.bfloat16)
    h_ref = jnp.dot(xb, w1.astype(jnp.bfloat16),
                    preferred_element_type=jnp.float32) + b1
    h_ref = jax.nn.gelu(h_ref, approximate=False)
    ref2d = jnp.dot(h_ref.astype(jnp.bfloat16), w2.astype(jnp.bfloat16),
                    preferred_element_type=jnp.float32) + b2
    ref = ref2d.reshape(B, S, H)

    assert out.shape == (B, S, H)
    assert out.dtype == jnp.float32
    assert jnp.allclose(out, ref, atol=1e-2, rtol=1e-2)
    assert monitor.records and monitor.records[0]["batch"] == B
    assert monitor.records[0]["seq"] == S

    print("KERNEL_OK")
</pallas_src>

<mosaic_0001>
module attributes {stable_mosaic.version = 11 : i64} {
  func.func @_mlp_kernel(%arg0: i32, %arg1: memref<8x128xf32, #tpu.memory_space<vmem>>, %arg2: memref<128x128xbf16, #tpu.memory_space<vmem>>, %arg3: memref<1x128xf32, #tpu.memory_space<vmem>>, %arg4: memref<128x128xbf16, #tpu.memory_space<vmem>>, %arg5: memref<1x128xf32, #tpu.memory_space<vmem>>, %arg6: memref<8x128xf32, #tpu.memory_space<vmem>>) attributes {dimension_semantics = [#tpu.dimension_semantics<parallel>], iteration_bounds = array<i64: 2>, scalar_prefetch = 0 : i64, scratch_operands = 0 : i64, tpu.core_type = #tpu.core_type<tc>, window_params = [{transform_indices = @transform_0, window_bounds = array<i64: 8, 128>}, {pipeline_mode = #tpu.pipeline_mode<synchronous>, transform_indices = @transform_1, window_bounds = array<i64: 128, 128>}, {pipeline_mode = #tpu.pipeline_mode<synchronous>, transform_indices = @transform_2, window_bounds = array<i64: 1, 128>}, {pipeline_mode = #tpu.pipeline_mode<synchronous>, transform_indices = @transform_3, window_bounds = array<i64: 128, 128>}, {pipeline_mode = #tpu.pipeline_mode<synchronous>, transform_indices = @transform_4, window_bounds = array<i64: 1, 128>}, {transform_indices = @transform_5, window_bounds = array<i64: 8, 128>}]} {
    %c0 = arith.constant 0 : index
    %c0_0 = arith.constant 0 : index
    %0 = vector.load %arg1[%c0, %c0_0] : memref<8x128xf32, #tpu.memory_space<vmem>>, vector<8x128xf32>
    %1 = arith.truncf %0 : vector<8x128xf32> to vector<8x128xbf16>
    %c0_1 = arith.constant 0 : index
    %c0_2 = arith.constant 0 : index
    %2 = vector.load %arg2[%c0_1, %c0_2] : memref<128x128xbf16, #tpu.memory_space<vmem>>, vector<128x128xbf16>
    %cst = arith.constant dense<0.000000e+00> : vector<8x128xf32>
    %3 = tpu.matmul %1, %2, %cst {dimension_numbers = #tpu.dot_dimension_numbers<[1], [0], [0], [1], [0, 0, 1, 1], [], []>} : vector<8x128xbf16>, vector<128x128xbf16>, vector<8x128xf32> -> vector<8x128xf32>
    %c0_3 = arith.constant 0 : index
    %c0_4 = arith.constant 0 : index
    %4 = vector.load %arg3[%c0_3, %c0_4] : memref<1x128xf32, #tpu.memory_space<vmem>>, vector<1x128xf32>
    %5 = vector.broadcast %4 : vector<1x128xf32> to vector<8x128xf32>
    %6 = arith.addf %3, %5 : vector<8x128xf32>
    %cst_5 = arith.constant 5.000000e-01 : f32
    %7 = vector.broadcast %cst_5 : f32 to vector<8x128xf32>
    %8 = arith.mulf %7, %6 : vector<8x128xf32>
    %cst_6 = arith.constant 0.707106769 : f32
    %9 = vector.broadcast %cst_6 : f32 to vector<8x128xf32>
    %10 = arith.mulf %6, %9 : vector<8x128xf32>
    %cst_7 = arith.constant 0.000000e+00 : f32
    %11 = vector.broadcast %cst_7 : f32 to vector<8x128xf32>
    %12 = arith.cmpf olt, %10, %11 : vector<8x128xf32>
    %cst_8 = arith.constant -1.000000e+00 : f32
    %cst_9 = arith.constant 1.000000e+00 : f32
    %13 = vector.broadcast %cst_8 : f32 to vector<8x128xf32>
    %14 = vector.broadcast %cst_9 : f32 to vector<8x128xf32>
    %15 = arith.select %12, %13, %14 : vector<8x128xi1>, vector<8x128xf32>
    %16 = math.absf %10 : vector<8x128xf32>
    %cst_10 = arith.constant 0.327591091 : f32
    %17 = vector.broadcast %cst_10 : f32 to vector<8x128xf32>
    %18 = arith.mulf %17, %16 : vector<8x128xf32>
    %cst_11 = arith.constant 1.000000e+00 : f32
    %19 = vector.broadcast %cst_11 : f32 to vector<8x128xf32>
    %20 = arith.addf %19, %18 : vector<8x128xf32>
    %21 = tpu.reciprocal %20 {approx = true} : vector<8x128xf32> -> vector<8x128xf32>
    %cst_12 = arith.constant 1.06140542 : f32
    %22 = vector.broadcast %cst_12 : f32 to vector<8x128xf32>
    %23 = arith.mulf %22, %21 : vector<8x128xf32>
    %cst_13 = arith.constant -1.45315206 : f32
    %24 = vector.broadcast %cst_13 : f32 to vector<8x128xf32>
    %25 = arith.addf %23, %24 : vector<8x128xf32>
    %26 = arith.mulf %25, %21 : vector<8x128xf32>
    %cst_14 = arith.constant 1.42141378 : f32
    %27 = vector.broadcast %cst_14 : f32 to vector<8x128xf32>
    %28 = arith.addf %26, %27 : vector<8x128xf32>
    %29 = arith.mulf %28, %21 : vector<8x128xf32>
    %cst_15 = arith.constant -0.284496725 : f32
    %30 = vector.broadcast %cst_15 : f32 to vector<8x128xf32>
    %31 = arith.addf %29, %30 : vector<8x128xf32>
    %32 = arith.mulf %31, %21 : vector<8x128xf32>
    %cst_16 = arith.constant 0.254829586 : f32
    %33 = vector.broadcast %cst_16 : f32 to vector<8x128xf32>
    %34 = arith.addf %32, %33 : vector<8x128xf32>
    %35 = arith.mulf %34, %21 : vector<8x128xf32>
    %cst_17 = arith.constant 0.000000e+00 : f32
    %36 = vector.broadcast %cst_17 : f32 to vector<8x128xf32>
    %37 = arith.subf %36, %16 : vector<8x128xf32>
    %38 = arith.mulf %37, %16 : vector<8x128xf32>
    %39 = math.exp %38 : vector<8x128xf32>
    %40 = arith.mulf %35, %39 : vector<8x128xf32>
    %cst_18 = arith.constant 1.000000e+00 : f32
    %41 = vector.broadcast %cst_18 : f32 to vector<8x128xf32>
    %42 = arith.subf %41, %40 : vector<8x128xf32>
    %43 = arith.mulf %15, %42 : vector<8x128xf32>
    %cst_19 = arith.constant 1.000000e+00 : f32
    %44 = vector.broadcast %cst_19 : f32 to vector<8x128xf32>
    %45 = arith.addf %44, %43 : vector<8x128xf32>
    %46 = arith.mulf %8, %45 : vector<8x128xf32>
    %47 = arith.truncf %46 : vector<8x128xf32> to vector<8x128xbf16>
    %c0_20 = arith.constant 0 : index
    %c0_21 = arith.constant 0 : index
    %48 = vector.load %arg4[%c0_20, %c0_21] : memref<128x128xbf16, #tpu.memory_space<vmem>>, vector<128x128xbf16>
    %cst_22 = arith.constant dense<0.000000e+00> : vector<8x128xf32>
    %49 = tpu.matmul %47, %48, %cst_22 {dimension_numbers = #tpu.dot_dimension_numbers<[1], [0], [0], [1], [0, 0, 1, 1], [], []>} : vector<8x128xbf16>, vector<128x128xbf16>, vector<8x128xf32> -> vector<8x128xf32>
    %c0_23 = arith.constant 0 : index
    %c0_24 = arith.constant 0 : index
    %50 = vector.load %arg5[%c0_23, %c0_24] : memref<1x128xf32, #tpu.memory_space<vmem>>, vector<1x128xf32>
    %51 = vector.broadcast %50 : vector<1x128xf32> to vector<8x128xf32>
    %52 = arith.addf %49, %51 : vector<8x128xf32>
    %c0_25 = arith.constant 0 : index
    %c0_26 = arith.constant 0 : index
    %53 = vector.load %arg6[%c0_25, %c0_26] : memref<8x128xf32, #tpu.memory_space<vmem>>, vector<8x128xf32>
    tpu.vector_store %arg6[%c0_25, %c0_26], %52 {strides = array<i32>} : memref<8x128xf32, #tpu.memory_space<vmem>>, vector<8x128xf32>,
    return
  }
  func.func @transform_0(%arg0: i32) -> (i32, i32) {
    %c0_i32 = arith.constant 0 : i32
    %c0_i32_0 = arith.constant 0 : i32
    return %arg0, %c0_i32 : i32, i32
  }
  func.func @transform_1(%arg0: i32) -> (i32, i32) {
    %c0_i32 = arith.constant 0 : i32
    %c0_i32_0 = arith.constant 0 : i32
    %c0_i32_1 = arith.constant 0 : i32
    return %c0_i32, %c0_i32_0 : i32, i32
  }
  func.func @transform_2(%arg0: i32) -> (i32, i32) {
    %c0_i32 = arith.constant 0 : i32
    %c0_i32_0 = arith.constant 0 : i32
    %c0_i32_1 = arith.constant 0 : i32
    return %c0_i32, %c0_i32_0 : i32, i32
  }
  func.func @transform_3(%arg0: i32) -> (i32, i32) {
    %c0_i32 = arith.constant 0 : i32
    %c0_i32_0 = arith.constant 0 : i32
    %c0_i32_1 = arith.constant 0 : i32
    return %c0_i32, %c0_i32_0 : i32, i32
  }
  func.func @transform_4(%arg0: i32) -> (i32, i32) {
    %c0_i32 = arith.constant 0 : i32
    %c0_i32_0 = arith.constant 0 : i32
    %c0_i32_1 = arith.constant 0 : i32
    return %c0_i32, %c0_i32_0 : i32, i32
  }
  func.func @transform_5(%arg0: i32) -> (i32, i32) {
    %c0_i32 = arith.constant 0 : i32
    %c0_i32_0 = arith.constant 0 : i32
    return %arg0, %c0_i32 : i32, i32
  }
}

</mosaic_0001>

<bundles_post_ra>
// kernel: mlp_forward_pallas.1
= control target key start
LH: loop header
LB: loop body
LE: loop exit
PB: predicated region body
PF: predicated region fallthrough
CT: control target
= control target key end

     0   :  { %10 = vsyncpa [#allocation3], 0  ;;  %s1012_s0 = inlined_call_operand.vmem [shape: f32[16,128], index: 0, kind: input, shape index: {}]   ;;  %s1013_s1 = inlined_call_operand.vmem [shape: bf16[128,128], index: 1, kind: input, shape index: {}]   ;;  %s1014_s2 = inlined_call_operand.vmem [shape: f32[1,128], index: 2, kind: input, shape index: {}]   ;;  %s1015_s3 = inlined_call_operand.hbm [shape: bf16[128,128], index: 3, kind: input, shape index: {}]   ;;  %s1016_s4 = inlined_call_operand.vmem [shape: f32[1,128], index: 4, kind: input, shape index: {}]   ;;  %s1017_s5 = inlined_call_operand.hbm [shape: f32[16,128], index: 5, kind: output, shape index: {}]  }
   0x1   :  { %11 = vsyncpa [#allocation4], 0 }
   0x2   :  { %13 = vsyncpa [#allocation4 + $0x1], 0  ;;  %s865_s18 = smov 0   ;;  %s867_s19 = smov 0  }
   0x3   :  { %s869_s20 = smov 0   ;;  %s871_s21 = smov 0  }
   0x4 LB: > { %s886_s22 = sadd.s32 4294967295, %s826_s21   ;;  %s573_s23 = sadd.s32 4294967294, %s826_s21   ;;  %s826_s21 = sphi %s871_s21, %s1025_s21   ;;  %s822_s20 = sphi %s869_s20, %s1024_s20   ;;  %s818_s19 = sphi %s867_s19, %s1023_s19   ;;  %s814_s18 = sphi %s865_s18, %s1022_s18  }
   0x5   : > { %s890_s24 = sadd.s32 1, %s826_s21   ;;  %s136_s25 = sadd.s32 1, %s822_s20 }
   0x6   : > { %s133_s26 = ssub.s32 %s826_s21, %s890_s24  ;;  %p146_p0 = scmp.ne.s32.totalorder %s822_s20, %s818_s19 }
   0x7   : > { %p134_p1 = scmp.eq.s32.totalorder %s133_s26, 0  ;;  %p147_p2 = scmp.eq.s32.totalorder %s886_s22, 1 }
   0x8   : > { %p152_p3 = scmp.ne.s32.totalorder %s818_s19, %s814_s18  ;;  %p153_p4 = scmp.eq.s32.totalorder %s573_s23, 1 }
   0x9   : > { %s901_s27 = scalar_select %p134_p1, %s822_s20, %s136_s25  }
   0xa   : > { %p903_p5 = por %p147_p2, %p146_p0  ;;  %p907_p6 = por %p153_p4, %p152_p3 }
   0xb   : > { %p574_p7 = scmp.ge.s32.totalorder %s826_s21, 1  ;;  %p160_p8 = scmp.lt.s32.totalorder %s826_s21, 3 }
   0xc   : > { %s1019_s29 = scalar_select %p907_p6, 1, 0 }
   0xd   : > { %p675_p9 = scmp.eq.s32.totalorder %s886_s22, 0  ;;  %p914_p10 = pnand %p574_p7, %p160_p8 }
   0xe   : > { %s828_s6 = smov [#allocation2]  }
   0xf   : > { %s178_s7 = sshll.u32 %s828_s6, 4  ;;  %p667_p11 = pneg %p914_p10  ;;  %s179_s7 = int_to_ptr.vmem [resolvable:$true] %s178_s7 }
  0x10   : > { %s747_s8 = scalar_lea.vmem %s179_s7, 1024  ;;  %p755_p3 = scmp.lt.s32.totalorder %s179_s7, %s179_s7 }
  0x11   : > { %p668_p12 = pnand %p675_p9, %p667_p11  ;;  %p748_p0 = scmp.ne.s32.totalorder %s179_s7, %s747_s8 }
  0x12   : > { %p756_p4 = scmp.lt.s32.totalorder %s747_s8, %s747_s8 }
  0x13   : > { %p738_p13 = pneg %p668_p12 }
  0x14   : > { %p757_p6 = por %p756_p4, %p755_p3 }
  0x15   : > { %p750_p1 = pnand %p748_p0, %p738_p13 }
  0x17   : > { %p751_p2 = pneg %p750_p1 }
  0x19   : > { %p758_p7 = pnand %p757_p6, %p751_p2 }
  0x1b   : > { %761 = shalt.err (!%p758_p7)
}
  0x1c   : > { %s829_s9 = smov 64   ;;  %s830_s10 = smov 4  }
  0x1d   : > { %670 = dma.hbm_to_vmem [thread:$0]  (!%p668_p12), %s1015_s3, 1024, %s179_s7, [#allocation3], %s829_s9, %s829_s9, %s830_s10  }
  0x1e   : > { %204 = sbr.rel (%p914_p10) target bundleno = 526 (0x20e), region = 40 }
  0x23   : > { %805 = dma.done.wait (%p675_p9), [#allocation3], 1024  }
  0x24   : > { %807 = vsyncadd (%p675_p9), [#allocation3], 4294966272  ;;  %v831_v0 = vmov 0.0   ;;  %vm832_vm0 = vmmov 0   ;;  %v716_v1 = vld [vmem:[%s1013_s1 + $0x38] sm:$0xff]   ;;  %v717_v2 = vld [vmem:[%s1013_s1 + $0x30] sm:$0xff]  }
  0x25   : > { %621 = vmatprep.subr.bf16.mxu0 %v831_v0  ;;  %637 = vmatprep.mubr.msk.bf16.mxu0 %vm832_vm0, %v831_v0  ;;  %v718_v3 = vld [vmem:[%s1013_s1 + $0x28] sm:$0xff]   ;;  %v719_v4 = vld [vmem:[%s1013_s1 + $0x20] sm:$0xff]   ;;  %p231_p6 = scmp.lt.s32.totalorder %s886_s22, 1  ;;  %v720_v5 = vld [vmem:[%s1013_s1 + $0x18] sm:$0xff]   ;;  %v833_v45 = vmov 1.0   ;;  %s228_s26 = sand.u32 1, %s818_s19  }
  0x26   : > { %641 = vmatprep.subr.bf16.mxu1 %v831_v0  ;;  %657 = vmatprep.mubr.msk.bf16.mxu1 %vm832_vm0, %v831_v0  ;;  %v721_v6 = vld [vmem:[%s1013_s1 + $0x10] sm:$0xff]   ;;  %v722_v7 = vld [vmem:[%s1013_s1 + $0x8] sm:$0xff]   ;;  %v723_v8 = vld [vmem:[%s1013_s1] sm:$0xff]   ;;  %s579_s30 = sshll.u32 %s228_s26, 3  ;;  %s600_s8 = sshll.u32 %s886_s22, 7 }
  0x27   : > { %622 = vmatpush3.bf16.msra.mxu0 %v716_v1  ;;  %s232_s7 = scalar_select %p231_p6, %s886_s22, 1  ;;  %v724_v11 = vld [vmem:[#allocation2 + $0x38] sm:$0xff]   ;;  %v725_v12 = vld [vmem:[#allocation2 + $0x30] sm:$0xff]   ;;  %v726_v13 = vld [vmem:[#allocation2 + $0x28] sm:$0xff]  }
  0x28   : > { %623 = vmatprep.subr.bf16.mxu0 %v831_v0  ;;  %642 = vmatpush3.bf16.msra.mxu1 %v724_v11  ;;  %v727_v14 = vld [vmem:[#allocation2 + $0x20] sm:$0xff]   ;;  %v728_v15 = vld [vmem:[#allocation2 + $0x18] sm:$0xff]   ;;  %v729_v16 = vld [vmem:[#allocation2 + $0x10] sm:$0xff]   ;;  %s230_s9 = scalar_lea.vmem [#allocation5], %s579_s30  ;;  %s971_s13 = scalar_lea.hbm %s1017_s5, %s600_s8 }
  0x29   : > { %s580_s10 = sshll.u32 %s232_s7, 3  ;;  %643 = vmatprep.subr.bf16.mxu1 %v831_v0  ;;  %v730_v17 = vld [vmem:[#allocation2 + $0x8] sm:$0xff]   ;;  %v731_v18 = vld [vmem:[#allocation2] sm:$0xff]   ;;  %s489_s14 = scalar_lea.sflag [#allocation4], %s228_s26 }
  0x2a   : > { %s234_s15 = scalar_lea.vmem %s1012_s0, %s580_s10  ;;  %v581_v19 = vld [vmem:[%s1014_s2] ss:$0 sm:$0xff]  ;;  %s502_s10 = sshll.u32 %s230_s9, 4  ;;  %s973_s10 = int_to_ptr.vmem [resolvable:$true] %s502_s10 }
  0x2b   : > { %624 = vmatpush3.bf16.msra.mxu0 %v717_v2  ;;  %v236_v9 = vld [vmem:[%s234_s15] sm:$0xff]  ;;  %s762_s15 = scalar_lea.vmem %s973_s10, 128  ;;  %s834_s22 = smov [#allocation5]  }
  0x2c   : > { %625 = vmatprep.subr.bf16.mxu0 %v831_v0  ;;  %v237_v10 = vpack.c.bf16 %v236_v9, %v236_v9  ;;  %644 = vmatpush3.bf16.msra.mxu1 %v725_v12  ;;  %v590_v52 = vld [vmem:[%s1016_s4] ss:$0 sm:$0xff]  ;;  %p763_p8 = scmp.ne.s32.totalorder %s973_s10, %s762_s15  ;;  %s766_s16 = sshll.u32 %s834_s22, 4  ;;  %s767_s16 = int_to_ptr.vmem [resolvable:$false] %s766_s16 }
  0x2d   : > { %645 = vmatprep.subr.bf16.mxu1 %v831_v0  ;;  %s768_s17 = scalar_lea.vmem %s767_s16, 256  ;;  %p769_p11 = scmp.lt.s32.totalorder %s973_s10, %s767_s16 }
  0x2e   : > { %p764_p9 = pnand %p763_p8, %p903_p5  ;;  %p770_p12 = scmp.lt.s32.totalorder %s768_s17, %s762_s15 }
  0x2f   : > { %626 = vmatpush3.bf16.msra.mxu0 %v718_v3 }
  0x30   : > { %627 = vmatprep.subr.bf16.mxu0 %v831_v0  ;;  %646 = vmatpush3.bf16.msra.mxu1 %v726_v13  ;;  %p765_p10 = pneg %p764_p9  ;;  %p771_p13 = por %p770_p12, %p769_p11 }
  0x31   : > { %647 = vmatprep.subr.bf16.mxu1 %v831_v0 }
  0x32   : > { %p772_p0 = pnand %p771_p13, %p765_p10 }
  0x33   : > { %628 = vmatpush3.bf16.msra.mxu0 %v719_v4 }
  0x34   : > { %629 = vmatprep.subr.bf16.mxu0 %v831_v0  ;;  %648 = vmatpush3.bf16.msra.mxu1 %v727_v14 }
  0x35   : > { %649 = vmatprep.subr.bf16.mxu1 %v831_v0 }
  0x37   : > { %630 = vmatpush3.bf16.msra.mxu0 %v720_v5 }
  0x38   : > { %631 = vmatprep.subr.bf16.mxu0 %v831_v0  ;;  %650 = vmatpush3.bf16.msra.mxu1 %v728_v15 }
  0x39   : > { %651 = vmatprep.subr.bf16.mxu1 %v831_v0 }
  0x3b   : > { %632 = vmatpush3.bf16.msra.mxu0 %v721_v6 }
  0x3c   : > { %633 = vmatprep.subr.bf16.mxu0 %v831_v0  ;;  %652 = vmatpush3.bf16.msra.mxu1 %v729_v16 }
  0x3d   : > { %653 = vmatprep.subr.bf16.mxu1 %v831_v0 }
  0x3f   : > { %634 = vmatpush3.bf16.msra.mxu0 %v722_v7 }
  0x40   : > { %635 = vmatprep.subr.bf16.mxu0 %v831_v0  ;;  %654 = vmatpush3.bf16.msra.mxu1 %v730_v17 }
  0x41   : > { %655 = vmatprep.subr.bf16.mxu1 %v831_v0 }
  0x43   : > { %636 = vmatpush3.bf16.msra.mxu0 %v723_v8 }
  0x44   : > { %656 = vmatpush3.bf16.msra.mxu1 %v731_v18 }
  0x46   : > { %638 = vmatmul.mubr.bf16.vlgmr.msra.gmra.mxu0 %v237_v10 }
 0x106   : > { %v343_v20 = vpop.f32.mrf.mxu0 }
 0x107   : > { %v344_v21 = vadd.f32 %v581_v19, %v343_v20 }
 0x108   : > { %v639_v22 = vpop.f32.mrf.mxu0 }
 0x109   : > { %v350_v23 = vmul.f32 0.70710677, %v344_v21  ;;  %v349_v48 = vmul.f32 0.5, %v344_v21 }
 0x10a   : > { %v346_v24 = vpop.f32.mrf.mxu0 }
 0x10b   : > { %v353_v25 = vand.u32 2147483647, %v350_v23  ;;  %vm351_vm1 = vcmp.lt.f32.partialorder %v350_v23, 0.0 }
 0x10c   : > { %v640_v26 = vpop.f32.mrf.mxu0  ;;  %v352_v46 = vsel %vm351_vm1, -1.0, %v833_v45 }
 0x10d   : > { %v354_v27 = vmul.f32 0.3275911, %v353_v25  ;;  %v366_v29 = vsub.f32 0.0, %v353_v25 }
 0x10f   : > { %v355_v28 = vadd.f32 1.0, %v354_v27  ;;  %v367_v30 = vmul.f32 %v366_v29, %v353_v25 }
 0x111   : > { %732 = vrcp.f32 %v355_v28  ;;  %v368_v33 = vmul.f32 1.442695, %v367_v30 }
 0x113   : > { %734 = vpow2.f32 %v368_v33 }
 0x11e   : > { %v733_v31 = vpop.eup %732 }
 0x11f   : > { %v357_v32 = vmul.f32 1.0614054, %v733_v31 }
 0x120   : > { %v735_v42 = vpop.eup %734 }
 0x121   : > { %v358_v34 = vadd.f32 -1.4531521, %v357_v32 }
 0x123   : > { %v359_v35 = vmul.f32 %v733_v31, %v358_v34 }
 0x125   : > { %v360_v36 = vadd.f32 1.4214138, %v359_v35 }
 0x127   : > { %v361_v37 = vmul.f32 %v733_v31, %v360_v36 }
 0x129   : > { %v362_v38 = vadd.f32 -0.28449672, %v361_v37 }
 0x12b   : > { %v363_v39 = vmul.f32 %v733_v31, %v362_v38 }
 0x12d   : > { %v364_v40 = vadd.f32 0.2548296, %v363_v39 }
 0x12f   : > { %v365_v41 = vmul.f32 %v733_v31, %v364_v40 }
 0x131   : > { %v370_v43 = vmul.f32 %v735_v42, %v365_v41 }
 0x133   : > { %v371_v44 = vsub.f32 1.0, %v370_v43 }
 0x135   : > { %v372_v47 = vmul.f32 %v371_v44, %v352_v46 }
 0x137   : > { %v373_v49 = vadd.f32 1.0, %v372_v47 }
 0x139   : > { %v374_v50 = vmul.f32 %v373_v49, %v349_v48 }
 0x13b   : > { %v375_v51 = vpack.c.bf16 %v374_v50, %v374_v50 }
 0x13d   : > { %658 = vmatmul.mubr.bf16.vlgmr.msra.gmra.mxu1 %v375_v51 }
 0x1fd   : > { %v481_v53 = vpop.f32.mrf.mxu1 }
 0x1fe   : > { %v482_v54 = vadd.f32 %v590_v52, %v481_v53 }
 0x1ff   : > { %v659_v55 = vpop.f32.mrf.mxu1 }
 0x200   : > { %487 = vst [vmem:[%s230_s9] sm:$0xff] %v482_v54 }
 0x201   : > { %v484_v56 = vpop.f32.mrf.mxu1 }
 0x202   : > { %775 = shalt.err (!%p772_p0)
}
 0x203   : > { %s776_s23 = scalar_lea.hbm %s971_s13, 128  ;;  %s780_s30 = scalar_lea.hbm %s1017_s5, 256 }
 0x204   : > { %p777_p1 = scmp.ne.s32.totalorder %s971_s13, %s776_s23  ;;  %p781_p4 = scmp.lt.s32.totalorder %s971_s13, %s1017_s5 }
 0x205   : > { %p782_p7 = scmp.lt.s32.totalorder %s780_s30, %s776_s23 }
 0x206   : > { %p778_p2 = pnand %p777_p1, %p903_p5 }
 0x207   : > { %p783_p6 = por %p782_p7, %p781_p4 }
 0x208   : > { %p779_p3 = pneg %p778_p2 }
 0x20a   : > { %p784_p8 = pnand %p783_p6, %p779_p3 }
 0x20c   : > { %787 = shalt.err (!%p784_p8)
}
 0x20d   : > { %665 = dma.vmem_to_hbm [thread:$0]  (%p903_p5), %s973_s10, 128, %s971_s13, %s489_s14   ;;  %v660_v57 = vpop.f32.mrf.mxu1 }
 0x20e PF: > { %p677_p9 = scmp.ge.s32.totalorder %s826_s21, 2  ;;  %s514_s8 = sand.u32 1, %s814_s18  }
 0x20f   : > { %p1021_p10 = scmp.ne.s32.totalorder %s1019_s29, 0  ;;  %s515_s9 = scalar_lea.sflag [#allocation4], %s514_s8 }
 0x211   : > { %p672_p11 = pnand %p677_p9, %p1021_p10 }
 0x213   : > { %p673_p12 = pneg %p672_p11 }
 0x215   : > { %809 = dma.done.wait (%p673_p12), %s515_s9, 128  }
 0x216   : > { %811 = vsyncadd (%p673_p12), %s515_s9, 4294967168  ;;  %p16_p13 = scmp.ge.s32.totalorder %s890_s24, 4   ;;  %s1022_s18 = smov %s818_s19 }
 0x217   : > { %s1023_s19 = smov %s822_s20  ;;  %s1024_s20 = smov %s901_s27 }
 0x218   : > { %s1025_s21 = smov %s890_s24  ;;  %18 = sbr.rel (!%p16_p13) target bundleno = 4 (0x4), region = 80 }
 0x21d   :  { %520 = vsyncpa [#allocation3], 1 }
 0x21e   :  { %522 = vsyncpa [#allocation3 + $0x1], 1 }
 0x21f   :  { %523 = vsyncpa [#allocation4], 1 }
 0x220   :  { %525 = vsyncpa [#allocation4 + $0x1], 1 }

</bundles_post_ra>
